<compile_context>
chip_gen: v6e
topology: v6e:2x2x1
jax: 0.10.0
libtpu: 0.0.40
codegen_flags: <defaults>
</compile_context>

<pallas_src>
import functools

import jax
import jax.numpy as jnp
from jax.experimental import pallas as pl
from jax.experimental.pallas import tpu as pltpu

_LANE = 128
_SUBLANE = 8


def _round_up(x, m):
    return ((x + m - 1) // m) * m


def _nll_seq_kernel(tgt_ref, lim_ref, x_ref, w_ref, out_ref, acc_ref, *,
                    num_classes, row_len, guard_cols):
    b = pl.program_id(0)
    ti = pl.program_id(1)
    nb = pl.num_programs(0)
    nt = pl.num_programs(1)

    @pl.when(jnp.logical_and(b == 0, ti == 0))
    def _init():
        acc_ref[...] = jnp.zeros_like(acc_ref)

    tgt_b = tgt_ref[b]          # int32 target class of sample b             (SMEM)
    lim_b = lim_ref[b]          # int32 flat limit = max(min(T,len[b])-1,0)*C (SMEM)
    w_b = w_ref[tgt_b]          # f32 class weight w[target[b]]              (SMEM)

    x_blk = x_ref[...].astype(jnp.float32)            # (S, l_tile), dense vregs
    S, L = x_blk.shape

    # Flat index inside batch row b: g = sublane*row_len + (ti*l_tile + lane).
    col = ti * L + jax.lax.broadcasted_iota(jnp.int32, (S, L), 1)
    g = jax.lax.broadcasted_iota(jnp.int32, (S, L), 0) * row_len + col

    # flat = t*C + c, so c == g % C and (t < len-1) <=> (g < (len-1)*C).
    if num_classes & (num_classes - 1) == 0:           # power of two -> AND
        cls = g & (num_classes - 1)
    else:
        cls = g % num_classes
    keep = jnp.logical_and(cls == tgt_b, g < lim_b)
    if guard_cols:                                     # only when T*C was padded
        keep = jnp.logical_and(keep, col < row_len)

    # loss[b,t] = -w[target[b]] * logp[b,t,target[b]]; where-select is NaN-safe.
    acc_ref[...] += jnp.where(keep, x_blk, 0.0) * (-w_b)

    @pl.when(jnp.logical_and(b == nb - 1, ti == nt - 1))
    def _finalize():
        num = jnp.sum(acc_ref[...], axis=0, keepdims=True)    # (1, L)
        num = jnp.sum(num, axis=1, keepdims=True)             # (1, 1)
        out_ref[...] = num.astype(out_ref.dtype)


def nll_sequence_loss(x, length, target, weight, *, l_tile_max=16384,
                      interpret=False):
    """x: (B, T, C) float log-probs; length/target: (B,) int; weight: (C,) float."""
    B, T, C = x.shape
    TC = T * C

    # Lay x out dense for the kernel with free reshapes only:
    #   (B, T, C) -> (B, T*C) -> (B, S, T*C/S) with S = 8 when possible, so
    # tiles fill all 8 sublanes x 128 lanes of each vreg and DMA is contiguous.
    S = _SUBLANE if TC % _SUBLANE == 0 else 1
    row_len = TC // S
    xr = x.reshape(B, S, row_len)

    l_tile_max = max(_LANE, (l_tile_max // _LANE) * _LANE)
    if row_len <= l_tile_max:
        l_tile = row_len                      # one tile per batch, no padding
        row_len_pad = row_len
    else:
        # TODO(synk): this pad is an extra XLA copy of x; only hit for very
        # long sequences (row_len > l_tile_max lanes).
        l_tile = l_tile_max
        row_len_pad = _round_up(row_len, l_tile)
        xr = jnp.pad(xr, ((0, 0), (0, 0), (0, row_len_pad - row_len)))

    tgt = target.astype(jnp.int32).reshape(B)
    # Valid steps per sample: max(min(T, length) - 1, 0); flat limit = *C.
    # TODO(synk): PyTorch's `mask[i, :L-1]` with L == 0 wraps to T-1 steps; we
    # treat length 0 as "no valid steps" (degenerate case).
    valid = jnp.maximum(jnp.minimum(T, length.astype(jnp.int32)) - 1, 0)  # (B,)
    lim = (valid * C).astype(jnp.int32).reshape(B)
    den = jnp.sum(valid).astype(jnp.float32)          # mask.sum(): O(B) scalars
    w = weight.astype(jnp.float32).reshape(C)

    grid = (B, row_len_pad // l_tile)
    kernel = functools.partial(_nll_seq_kernel, num_classes=C, row_len=row_len,
                               guard_cols=row_len_pad != row_len)

    num = pl.pallas_call(
        kernel,
        out_shape=jax.ShapeDtypeStruct((1, 1), jnp.float32),
        grid_spec=pltpu.PrefetchScalarGridSpec(
            num_scalar_prefetch=2,               # target, flat limits -> SMEM
            grid=grid,
            in_specs=[
                # x[b, :, ti*l_tile:(ti+1)*l_tile] -> (S, l_tile), dense vregs
                pl.BlockSpec((None, S, l_tile), lambda b, t, *_: (b, 0, t)),
                # class-weight table in SMEM; w[target[b]] read as a scalar
                pl.BlockSpec(memory_space=pltpu.MemorySpace.SMEM),
            ],
            out_specs=pl.BlockSpec((1, 1), lambda b, t, *_: (0, 0)),
            scratch_shapes=[
                pltpu.VMEM((S, l_tile), jnp.float32),   # per-lane numerator acc
            ],
        ),
        # The scalar accumulator is carried across both grid axes -> serial.
        # (For megacore one would emit per-core partials and reduce outside.)
        compiler_params=pltpu.CompilerParams(
            dimension_semantics=("arbitrary", "arbitrary")),
        interpret=interpret,
    )(tgt, lim, xr, w)

    # NOTE: den == 0 (all lengths <= 1) yields NaN/inf, same as the PyTorch module.
    return num[0, 0] / den


def _reference(x, length, target, weight):
    """Pure-JAX reference matching the PyTorch forward exactly."""
    B, T, C = x.shape
    logp = jnp.take_along_axis(
        x, target.astype(jnp.int32)[:, None, None], axis=2)[:, :, 0]   # (B, T)
    loss = -weight[target][:, None] * logp                             # (B, T)
    t_idx = jnp.arange(T, dtype=jnp.int32)[None, :]
    L = jnp.minimum(T, length.astype(jnp.int32))[:, None]
    mask = (t_idx < (L - 1)).astype(jnp.float32)
    return (loss * mask).sum() / mask.sum()


if __name__ == "__main__":
    key = jax.random.PRNGKey(0)
    weight = jnp.array([0.8, 0.8, 0.8, 0.5], dtype=jnp.float32)   # from __init__
    C = 4
    k1, k2, k3, k4, k5, k6 = jax.random.split(key, 6)

    # Config 1: module-implied toy shape (B=2, T=8, C=4); dense S=8 path.
    B1, T1 = 2, 8
    x1 = jax.nn.log_softmax(jax.random.normal(k1, (B1, T1, C), jnp.float32), -1)
    t1 = jax.random.randint(k2, (B1,), 0, C, dtype=jnp.int32)
    len1 = jnp.array([5, 8], dtype=jnp.int32)
    o1 = jax.block_until_ready(nll_sequence_loss(x1, len1, t1, weight))
    r1 = _reference(x1, len1, t1, weight)
    assert jnp.allclose(o1, r1, rtol=3e-5, atol=1e-5), (o1, r1)

    # Config 2: longer T, length clamping (length > T) and a tiny length.
    B2, T2 = 3, 700
    x2 = jax.nn.log_softmax(jax.random.normal(k3, (B2, T2, C), jnp.float32), -1)
    t2 = jax.random.randint(k4, (B2,), 0, C, dtype=jnp.int32)
    len2 = jnp.array([650, 900, 2], dtype=jnp.int32)
    o2 = jax.block_until_ready(nll_sequence_loss(x2, len2, t2, weight))
    r2 = _reference(x2, len2, t2, weight)
    assert jnp.allclose(o2, r2, rtol=3e-5, atol=1e-5), (o2, r2)

    # Config 2b: same data, tiny tile cap -> multi-tile grid + padded-tail guard.
    o2b = jax.block_until_ready(
        nll_sequence_loss(x2, len2, t2, weight, l_tile_max=256))
    assert jnp.allclose(o2b, r2, rtol=3e-5, atol=1e-5), (o2b, r2)

    # Config 3: T*C not divisible by 8 -> single-sublane fallback layout.
    B3, T3 = 2, 7
    x3 = jax.nn.log_softmax(jax.random.normal(k5, (B3, T3, C), jnp.float32), -1)
    t3 = jax.random.randint(k6, (B3,), 0, C, dtype=jnp.int32)
    len3 = jnp.array([7, 3], dtype=jnp.int32)
    o3 = jax.block_until_ready(nll_sequence_loss(x3, len3, t3, weight))
    r3 = _reference(x3, len3, t3, weight)
    assert jnp.allclose(o3, r3, rtol=3e-5, atol=1e-5), (o3, r3)

    print("KERNEL_OK")
</pallas_src>

<mosaic_0001>
module attributes {stable_mosaic.version = 11 : i64} {
  func.func @_nll_seq_kernel(%arg0: i32, %arg1: i32, %arg2: memref<2xi32, #tpu.memory_space<smem>>, %arg3: memref<2xi32, #tpu.memory_space<smem>>, %arg4: memref<1x8x4xf32, #tpu.memory_space<vmem>>, %arg5: memref<4xf32, #tpu.memory_space<smem>>, %arg6: memref<1x1xf32, #tpu.memory_space<vmem>>, %arg7: memref<8x4xf32, #tpu.memory_space<vmem>>) attributes {dimension_semantics = [#tpu.dimension_semantics<arbitrary>, #tpu.dimension_semantics<arbitrary>], iteration_bounds = array<i64: 2, 1>, scalar_prefetch = 2 : i64, scratch_operands = 1 : i64, tpu.core_type = #tpu.core_type<tc>, window_params = [{transform_indices = @transform_0, window_bounds = array<i64: 1, 8, 4>}, {transform_indices = @transform_1, window_bounds = array<i64: 4>}, {pipeline_mode = #tpu.pipeline_mode<synchronous>, transform_indices = @transform_2, window_bounds = array<i64: 1, 1>}]} {
    %c0_i32 = arith.constant 0 : i32
    %0 = arith.cmpi eq, %arg0, %c0_i32 : i32
    %c0_i32_0 = arith.constant 0 : i32
    %1 = arith.cmpi eq, %arg1, %c0_i32_0 : i32
    %2 = arith.andi %0, %1 : i1
    %3 = arith.extui %2 : i1 to i32
    %c0_i32_1 = arith.constant 0 : i32
    %4 = arith.cmpi ne, %3, %c0_i32_1 : i32
    scf.if %4 {
      %cst_12 = arith.constant 0.000000e+00 : f32
      %41 = vector.broadcast %cst_12 : f32 to vector<8x4xf32>
      %c0_13 = arith.constant 0 : index
      %c0_14 = arith.constant 0 : index
      %42 = vector.load %arg7[%c0_13, %c0_14] : memref<8x4xf32, #tpu.memory_space<vmem>>, vector<8x4xf32>
      tpu.vector_store %arg7[%c0_13, %c0_14], %41 {strides = array<i32>} : memref<8x4xf32, #tpu.memory_space<vmem>>, vector<8x4xf32>,
    } else {
    }
    %5 = arith.index_cast %arg0 : i32 to index
    %6 = memref.load %arg2[%5] : memref<2xi32, #tpu.memory_space<smem>>
    %7 = arith.index_cast %arg0 : i32 to index
    %8 = memref.load %arg3[%7] : memref<2xi32, #tpu.memory_space<smem>>
    %9 = arith.index_cast %6 : i32 to index
    %10 = memref.load %arg5[%9] : memref<4xf32, #tpu.memory_space<smem>>
    %c0 = arith.constant 0 : index
    %c0_2 = arith.constant 0 : index
    %c0_3 = arith.constant 0 : index
    %11 = vector.load %arg4[%c0, %c0_2, %c0_3] : memref<1x8x4xf32, #tpu.memory_space<vmem>>, vector<1x8x4xf32>
    %12 = vector.shape_cast %11 : vector<1x8x4xf32> to vector<8x4xf32>
    %c4_i32 = arith.constant 4 : i32
    %13 = arith.muli %arg1, %c4_i32 : i32
    %14 = tpu.iota {dimensions = array<i32: 1>} : vector<8x4xi32>
    %15 = vector.broadcast %13 : i32 to vector<8x4xi32>
    %16 = arith.addi %15, %14 : vector<8x4xi32>
    %17 = tpu.iota {dimensions = array<i32: 0>} : vector<8x4xi32>
    %c4_i32_4 = arith.constant 4 : i32
    %18 = vector.broadcast %c4_i32_4 : i32 to vector<8x4xi32>
    %19 = arith.muli %17, %18 : vector<8x4xi32>
    %20 = arith.addi %19, %16 : vector<8x4xi32>
    %c3_i32 = arith.constant 3 : i32
    %21 = vector.broadcast %c3_i32 : i32 to vector<8x4xi32>
    %22 = arith.andi %20, %21 : vector<8x4xi32>
    %23 = vector.broadcast %6 : i32 to vector<8x4xi32>
    %24 = arith.cmpi eq, %22, %23 : vector<8x4xi32>
    %25 = vector.broadcast %8 : i32 to vector<8x4xi32>
    %26 = arith.cmpi slt, %20, %25 : vector<8x4xi32>
    %27 = arith.andi %24, %26 : vector<8x4xi1>
    %c0_5 = arith.constant 0 : index
    %c0_6 = arith.constant 0 : index
    %28 = vector.load %arg7[%c0_5, %c0_6] : memref<8x4xf32, #tpu.memory_space<vmem>>, vector<8x4xf32>
    %cst = arith.constant 0.000000e+00 : f32
    %29 = vector.broadcast %cst : f32 to vector<8x4xf32>
    %30 = arith.select %27, %12, %29 : vector<8x4xi1>, vector<8x4xf32>
    %cst_7 = arith.constant 0.000000e+00 : f32
    %31 = arith.subf %cst_7, %10 : f32
    %32 = vector.broadcast %31 : f32 to vector<8x4xf32>
    %33 = arith.mulf %30, %32 : vector<8x4xf32>
    %34 = arith.addf %28, %33 : vector<8x4xf32>
    %c0_8 = arith.constant 0 : index
    %c0_9 = arith.constant 0 : index
    %35 = vector.load %arg7[%c0_8, %c0_9] : memref<8x4xf32, #tpu.memory_space<vmem>>, vector<8x4xf32>
    tpu.vector_store %arg7[%c0_8, %c0_9], %34 {strides = array<i32>} : memref<8x4xf32, #tpu.memory_space<vmem>>, vector<8x4xf32>,
    %c1_i32 = arith.constant 1 : i32
    %36 = arith.cmpi eq, %arg0, %c1_i32 : i32
    %c0_i32_10 = arith.constant 0 : i32
    %37 = arith.cmpi eq, %arg1, %c0_i32_10 : i32
    %38 = arith.andi %36, %37 : i1
    %39 = arith.extui %38 : i1 to i32
    %c0_i32_11 = arith.constant 0 : i32
    %40 = arith.cmpi ne, %39, %c0_i32_11 : i32
    scf.if %40 {
      %c0_12 = arith.constant 0 : index
      %c0_13 = arith.constant 0 : index
      %41 = vector.load %arg7[%c0_12, %c0_13] : memref<8x4xf32, #tpu.memory_space<vmem>>, vector<8x4xf32>
      %cst_14 = arith.constant dense<0.000000e+00> : vector<4xf32>
      %42 = vector.multi_reduction <add>, %41, %cst_14 [0] : vector<8x4xf32> to vector<4xf32>
      %43 = vector.shape_cast %42 : vector<4xf32> to vector<1x4xf32>
      %cst_15 = arith.constant dense<0.000000e+00> : vector<1xf32>
      %44 = vector.multi_reduction <add>, %43, %cst_15 [1] : vector<1x4xf32> to vector<1xf32>
      %45 = vector.shape_cast %44 : vector<1xf32> to vector<1x1xf32>
      %c0_16 = arith.constant 0 : index
      %c0_17 = arith.constant 0 : index
      %46 = vector.load %arg6[%c0_16, %c0_17] : memref<1x1xf32, #tpu.memory_space<vmem>>, vector<1x1xf32>
      tpu.vector_store %arg6[%c0_16, %c0_17], %45 {strides = array<i32>} : memref<1x1xf32, #tpu.memory_space<vmem>>, vector<1x1xf32>,
    } else {
    }
    return
  }
  func.func @transform_0(%arg0: i32, %arg1: i32, %arg2: memref<2xi32, #tpu.memory_space<smem>>, %arg3: memref<2xi32, #tpu.memory_space<smem>>) -> (i32, i32, i32) {
    %c0_i32 = arith.constant 0 : i32
    %c0_i32_0 = arith.constant 0 : i32
    return %arg0, %c0_i32, %arg1 : i32, i32, i32
  }
  func.func @transform_1(%arg0: i32, %arg1: i32, %arg2: memref<2xi32, #tpu.memory_space<smem>>, %arg3: memref<2xi32, #tpu.memory_space<smem>>) -> i32 {
    %c0_i32 = arith.constant 0 : i32
    %c0_i32_0 = arith.constant 0 : i32
    return %c0_i32 : i32
  }
  func.func @transform_2(%arg0: i32, %arg1: i32, %arg2: memref<2xi32, #tpu.memory_space<smem>>, %arg3: memref<2xi32, #tpu.memory_space<smem>>) -> (i32, i32) {
    %c0_i32 = arith.constant 0 : i32
    %c0_i32_0 = arith.constant 0 : i32
    %c0_i32_1 = arith.constant 0 : i32
    return %c0_i32, %c0_i32_0 : i32, i32
  }
}

</mosaic_0001>

<bundles_post_ra>
// kernel: tpu_custom_call.1
= control target key start
LH: loop header
LB: loop body
LE: loop exit
PB: predicated region body
PF: predicated region fallthrough
CT: control target
= control target key end

     0   :  { %s573_s0 = inlined_call_operand.vmem [shape: s32[2], index: 0, kind: input, shape index: {}]   ;;  %s574_s2 = inlined_call_operand.vmem [shape: f32[2,8,4], index: 2, kind: input, shape index: {}]   ;;  %s575_s3 = inlined_call_operand.vmem [shape: f32[4], index: 3, kind: input, shape index: {}]   ;;  %s576_s4 = inlined_call_operand.hbm [shape: f32[1,1], index: 4, kind: output, shape index: {}]   ;;  %s577_s1 = inlined_call_operand.vmem [shape: s32[2], index: 1, kind: input, shape index: {}]  }
   0x1   :  { %s9_s17 = sshll.u32 %s573_s0, 4  ;;  %s13_s20 = sshll.u32 %s577_s1, 4  ;;  %s10_s17 = int_to_ptr.vmem [resolvable:$true] %s9_s17  ;;  %s14_s20 = int_to_ptr.vmem [resolvable:$true] %s13_s20 }
   0x2   :  { %s359_s21 = scalar_lea.vmem %s10_s17, 16  ;;  %p364_p1 = scmp.lt.s32.totalorder %s10_s17, %s10_s17 }
   0x3   :  { %p360_p0 = scmp.ne.s32.totalorder %s10_s17, %s359_s21  ;;  %p365_p2 = scmp.lt.s32.totalorder %s359_s21, %s359_s21 }
   0x5   :  { %p366_p3 = por %p365_p2, %p364_p1 }
   0x7   :  { %p367_p4 = pnand %p366_p3, %p360_p0 }
   0x9   :  { %370 = shalt.err (!%p367_p4)  }
   0xa   :  { %s456_s22 = smov [#allocation4]   ;;  %s371_s23 = scalar_lea.vmem %s14_s20, 16 }
   0xb   :  { %12 = dma.vmem_to_smem %s10_s17, 16, %s456_s22, [#allocation3] }
   0xc   :  { %p372_p5 = scmp.ne.s32.totalorder %s14_s20, %s371_s23  ;;  %p376_p6 = scmp.lt.s32.totalorder %s14_s20, %s14_s20 }
   0xd   :  { %p377_p7 = scmp.lt.s32.totalorder %s371_s23, %s371_s23 }
   0xf   :  { %p378_p8 = por %p377_p7, %p376_p6 }
  0x11   :  { %p379_p9 = pnand %p378_p8, %p372_p5 }
  0x13   :  { %382 = shalt.err (!%p379_p9)  }
  0x14   :  { %s457_s0 = smov [#allocation5]  }
  0x15   :  { %16 = dma.vmem_to_smem %s14_s20, 16, %s457_s0, [#allocation3] }
  0x16   :  { %434 = dma.done.wait [#allocation3], 32 }
  0x17   :  { %435 = vsyncadd [#allocation3], 4294967264 }
  0x18   :  { %18 = sfence }
  0x19   :  { %19 = vsyncpa [#allocation8], 0 }
  0x1a   :  { %20 = vsyncpa [#allocation7], 0  ;;  %s492_s1 = smov 0   ;;  %s494_s24 = smov 0  }
  0x1b   :  { %s496_s25 = smov 0  }
  0x1c LB: > { %s299_s26 = sadd.s32 4294967295, %s454_s25   ;;  %s38_s27 = sadd.s32 1, %s450_s24  ;;  %s454_s25 = sphi %s496_s25, %s26_s25   ;;  %s450_s24 = sphi %s494_s24, %s582_s24   ;;  %s446_s1 = sphi %s492_s1, %s581_s1  }
  0x1d   : > { %p40_p10 = scmp.ge.s32.totalorder %s38_s27, 2  ;;  %p300_p11 = scmp.ge.s32.totalorder %s454_s25, 1 }
  0x1e   : > { %p113_p12 = scmp.lt.s32.totalorder %s454_s25, 3  ;;  %p519_p0 = scmp.eq.s32.totalorder %s299_s26, 0 }
  0x1f   : > { %s584_s27 = smov (%p40_p10, %s38_s27), 0  ;;  %s126_s6 = sshll.u32 %s575_s3, 4  ;;  %s127_s6 = int_to_ptr.vmem [resolvable:$true] %s126_s6 }
  0x20   : > { %p513_p13 = pnand %p300_p11, %p113_p12  ;;  %s383_s7 = scalar_lea.vmem %s127_s6, 16 }
  0x21   : > { %p384_p3 = scmp.ne.s32.totalorder %s127_s6, %s383_s7  ;;  %p391_p7 = scmp.lt.s32.totalorder %s127_s6, %s127_s6 }
  0x22   : > { %p322_p1 = pneg %p513_p13  ;;  %p392_p8 = scmp.lt.s32.totalorder %s383_s7, %s383_s7 }
  0x24   : > { %p323_p2 = pnand %p519_p0, %p322_p1  ;;  %p393_p9 = por %p392_p8, %p391_p7 }
  0x26   : > { %p385_p4 = pneg %p323_p2 }
  0x28   : > { %p386_p5 = pnand %p385_p4, %p384_p3 }
  0x2a   : > { %p387_p6 = pneg %p386_p5 }
  0x2c   : > { %p394_p10 = pnand %p393_p9, %p387_p6 }
  0x2e   : > { %397 = shalt.err (!%p394_p10)
}
  0x2f   : > { %s458_s8 = smov [#allocation6]   ;;  %149 = sbr.rel (%p513_p13) target bundleno = 258 (0x102), region = 28 }
  0x30   : > { %325 = dma.vmem_to_smem (!%p323_p2), %s127_s6, 16, %s458_s8, [#allocation8]  }
  0x34   : > { %437 = dma.done.wait (%p519_p0), [#allocation8], 16  }
  0x35   : > { %439 = vsyncadd (%p519_p0), [#allocation8], 4294967280 }
  0x36   : > { %155 = sfence }
  0x37   : > { %p169_p11 = scmp.lt.s32.totalorder %s446_s1, 1  ;;  %p176_p12 = scmp.eq.s32.totalorder %s446_s1, 0 }
  0x38   : > { %vm182_vm0 = vcmask (%p176_p12), 31744   ;;  %v459_v0 = vmov (%p176_p12), 0.0  }
  0x39   : > { %s170_s9 = scalar_select %p169_p11, %s446_s1, 1  ;;  %183 = vst.msk [vmem:[#allocation2] sm:$0xff] (%p176_p12), %vm182_vm0, %v459_v0 }
  0x3a   : > { %181 = sbr.rel (!%p176_p12) target bundleno = 63 (0x3f), region = 36 }
  0x3b   : > { %s305_s10 = sshll.u32 %s170_s9, 3 }
  0x3c   : > { %s175_s13 = scalar_lea.vmem %s574_s2, %s305_s10 }
  0x3f PF: > { %s184_s14 = sld [smem:[#allocation4 + %s446_s1]]  ;;  %v189_v1 = vlaneseq  ;;  %p211_p13 = scmp.eq.s32.totalorder %s446_s1, 1  ;;  %v187_v9 = vld [vmem:[%s175_s13] sm:$0xff]  ;;  %vm209_vm4 = vcmask 31744  }
  0x40   : > { %s185_s15 = sld [smem:[#allocation5 + %s446_s1]]  ;;  %v203_v11 = vld [vmem:[#allocation2] sm:$0xff]  ;;  %vm227_vm5 = vcmask (%p211_p13), 0  }
  0x41   : > { %v190_v2 = vand.u32 127, %v189_v1  ;;  %v194_v3 = vshrl.u32 %v189_v1, 7 }
  0x43   : > { %v195_v4 = vmul.u32 4, %v194_v3 }
  0x45   : > { %s186_s16 = sld [smem:[#allocation6 + %s184_s14]]  ;;  %v196_v5 = vadd.s32 %v195_v4, %v190_v2  ;;  %v198_v6 = vstv %s184_s14 }
  0x46   : > { %v200_v7 = vstv %s185_s15 }
  0x47   : > { %v197_v8 = vand.u32 3, %v196_v5  ;;  %vm201_vm1 = vcmp.lt.s32.totalorder %v196_v5, %v200_v7 }
  0x49   : > { %vm199_vm2 = vcmp.eq.s32.totalorder %v197_v8, %v198_v6 }
  0x4a   : > { %vm202_vm3 = vmand %vm199_vm2, %vm201_vm1 }
  0x4b   : > { %v204_v10 = vsel %vm202_vm3, %v187_v9, 0.0  ;;  %s205_s17 = ssub.f32 0.0, %s186_s16 }
  0x4d   : > { %v206_v12 = vstv %s205_s17 }
  0x4e   : > { %v207_v13 = vmul.f32 %v206_v12, %v204_v10  ;;  %215 = sbr.rel (!%p211_p13) target bundleno = 243 (0xf3), region = 40 }
  0x50   : > { %v208_v14 = vadd.f32 %v207_v13, %v203_v11 }
  0x52   : > { %210 = vst.msk [vmem:[#allocation2] sm:$0xff] %vm209_vm4, %v208_v14 }
  0x59   : > { %v216_v15 = vld [vmem:[#allocation2] sm:$0xff] }
  0x5a   : > { %v217_v16 = vsel %vm209_vm4, %v216_v15, 0.0 }
  0x5b   : > { %v218_v17 = vrot.slane %v217_v16, 4 }
  0x5d   : > { %v219_v18 = vadd.f32 %v218_v17, %v217_v16 }
  0x5f   : > { %v220_v19 = vrot.slane %v219_v18, 2 }
  0x61   : > { %v221_v20 = vadd.f32 %v220_v19, %v219_v18 }
  0x63   : > { %v222_v21 = vrot.slane %v221_v20, 1 }
  0x65   : > { %v223_v22 = vadd.f32 %v222_v21, %v221_v20 }
  0x67   : > { %v224_v23 = vsel %vm209_vm4, %v223_v22, 0.0 }
  0x68   : > { %225 = vadd.xlane.f32.xlu0 %v224_v23 }
  0xf1   : > { %v226_v24 = vpop.xlane.xlu0 %225 }
  0xf2   : > { %228 = vst.msk [vmem:[#allocation9] sm:$0x1] %vm227_vm5, %v226_v24 }
  0xf3 PF: > { %p549_p0 = scmp.eq.s32.totalorder %s299_s26, 1  ;;  %s460_s19 = smov [#allocation9]  }
  0xf4   : > { %s236_s20 = sshll.u32 %s460_s19, 4  ;;  %s237_s20 = int_to_ptr.vmem [resolvable:$true] %s236_s20 }
  0xf5   : > { %s398_s21 = scalar_lea.vmem %s237_s20, 16  ;;  %s404_s22 = scalar_lea.vmem %s237_s20, 32 }
  0xf6   : > { %p399_p1 = scmp.ne.s32.totalorder %s237_s20, %s398_s21  ;;  %p405_p4 = scmp.lt.s32.totalorder %s237_s20, %s237_s20 }
  0xf7   : > { %p406_p5 = scmp.lt.s32.totalorder %s404_s22, %s398_s21 }
  0xf8   : > { %p400_p2 = pnand %p399_p1, %p549_p0 }
  0xf9   : > { %p407_p6 = por %p406_p5, %p405_p4 }
  0xfa   : > { %p401_p3 = pneg %p400_p2 }
  0xfc   : > { %p408_p7 = pnand %p407_p6, %p401_p3 }
  0xfe   : > { %411 = shalt.err (!%p408_p7)
}
  0xff   : > { %319 = dma.vmem_to_hbm [thread:$0]  (%p549_p0), %s237_s20, 16, %s576_s4, [#allocation7]  }
 0x100   : > { %441 = dma.done.wait (%p549_p0), [#allocation7], 16  }
 0x101   : > { %443 = vsyncadd (%p549_p0), [#allocation7], 4294967280 }
 0x102 PF: > { %s26_s25 = sadd.s32 1, %s454_s25   ;;  %s581_s1 = smov %s450_s24 }
 0x103   : > { %p23_p8 = scmp.ge.s32.totalorder %s26_s25, 4   ;;  %s582_s24 = smov %s584_s27 }
 0x105   :  { %25 = sbr.rel (!%p23_p8) target bundleno = 28 (0x1c), region = 68 }
 0x10a   :  { %249 = vsyncpa [#allocation7], 1 }
 0x10b   :  { %251 = vsyncpa [#allocation7 + $0x1], 1 }
 0x10c   :  { %252 = vsyncpa [#allocation8], 1 }
 0x10d   :  { %254 = vsyncpa [#allocation8 + $0x1], 1 }

</bundles_post_ra>
